<compile_context>
chip_gen: v7x
topology: tpu7x:2x2x1
jax: 0.10.0
libtpu: 0.0.40
codegen_flags: <defaults>
</compile_context>

<pallas_src>
import functools

import jax
import jax.numpy as jnp
from jax.experimental import pallas as pl
from jax.experimental.pallas import tpu as pltpu


def _round_up(x, m):
    return (x + m - 1) // m * m


def _dqn_kernel(state_ref, points_ref, w_ref, b_ref, out_ref, *,
                n_obs, hidden, n_actions, batch, tile_b):
    """Feature-major DQN forward over one batch tile.

    state_ref  : (tile_b, 2*n_obs) f32   [loss | uncertainty] batch-major
    points_ref : (tile_b, n_obs)   f32
    w_ref      : (H, H + npad + apad) bf16 packed weights, 128-lane-aligned sections
    b_ref      : (H, 3) f32 biases (b1 | b2 | b3-padded) as columns
    out_ref    : (A, B_pad) f32 resident output block (softmax over the lane axis)
    """
    H, A, n = hidden, n_actions, n_obs
    npad = _round_up(n, 128)
    j = pl.program_id(0)

    # ---- unpack params (resident; section starts on 128-lane boundaries) ----
    w2 = w_ref[:, 0:H]                       # (H, H)  bf16
    w1 = w_ref[:, H:H + n]                   # (H, n)  bf16
    w3 = w_ref[:, H + npad:H + npad + A]     # (H, A)  bf16
    b1 = b_ref[:, 0:1]                       # (H, 1)  f32
    b2 = b_ref[:, 1:2]                       # (H, 1)  f32
    b3 = b_ref[0:A, 2:3]                     # (A, 1)  f32

    # ---- fold loss + uncertainty + points in VMEM (VPU) ----
    s = state_ref[...]                                       # (tb, 2n) f32
    x = s[:, 0:n] + s[:, n:2 * n] + points_ref[...]          # (tb, n)  f32
    xb = x.astype(jnp.bfloat16)

    # fc1: (H, n) contracted with (tb, n) -> (H, tb): batch lives on the lane axis.
    h1 = jax.lax.dot_general(w1, xb, (((1,), (1,)), ((), ())),
                             preferred_element_type=jnp.float32) + b1
    h1 = jnp.maximum(h1, 0.0)

    # fc2: (H, H) x (H, tb) -> (H, tb)
    h2 = jnp.dot(w2, h1.astype(jnp.bfloat16),
                 preferred_element_type=jnp.float32) + b2
    h2 = jnp.maximum(h2, 0.0)

    # fc3: (H, A)^T x (H, tb) -> (A, tb)   (MXU has spare capacity; keep VPU free)
    logits = jax.lax.dot_general(w3, h2.astype(jnp.bfloat16),
                                 (((0,), (0,)), ((), ())),
                                 preferred_element_type=jnp.float32) + b3

    # Stash unnormalized logits into the resident (A, B_pad) output block.
    off = pl.multiple_of(j * tile_b, tile_b)
    out_ref[:, pl.ds(off, tile_b)] = logits

    # Finalize: softmax over the batch (lane) axis once every tile has landed.
    @pl.when(j == pl.num_programs(0) - 1)
    def _():
        z = out_ref[...]                                      # (A, B_pad) f32
        lane = jax.lax.broadcasted_iota(jnp.int32, z.shape, 1)
        z = jnp.where(lane < batch, z, -jnp.inf)              # drop padded lanes
        m = jnp.max(z, axis=1, keepdims=True)                 # lane reduce
        e = jnp.exp(z - m)                                    # EUP
        ssum = jnp.sum(e, axis=1, keepdims=True)              # lane reduce
        r = pl.reciprocal(ssum, approx=True)                  # EUP slot
        r = r * (2.0 - ssum * r)                              # Newton step -> ~f32 exact
        out_ref[...] = e * r


def pack_params(params):
    """Pack weights into one bf16 slab (128-lane-aligned sections) + small f32 biases."""
    w1, b1 = params["w1"], params["b1"]   # (H, n_obs), (H,)
    w2, b2 = params["w2"], params["b2"]   # (H, H),     (H,)
    w3, b3 = params["w3"], params["b3"]   # (A, H),     (A,)
    H = w2.shape[0]
    A, n = w3.shape[0], w1.shape[1]
    npad, apad = _round_up(n, 128), _round_up(A, 128)
    w1p = jnp.zeros((H, npad), jnp.float32).at[:, :n].set(w1)
    w3p = jnp.zeros((H, apad), jnp.float32).at[:, :A].set(w3.T)
    w_slab = jnp.concatenate([w2, w1p, w3p], axis=1).astype(jnp.bfloat16)
    bias = (jnp.zeros((H, 3), jnp.float32)
            .at[:, 0].set(b1).at[:, 1].set(b2).at[:A, 2].set(b3))
    return w_slab, bias


@functools.partial(jax.jit, static_argnames=("n_actions", "tile_b"))
def dqn_forward(state, points, w_slab, bias, *, n_actions, tile_b=512):
    B, _, n = state.shape
    H = w_slab.shape[0]
    A = n_actions

    # (B, 2, n) -> (B, 2n): free bitcast; state/points stay batch-major in HBM.
    state2 = state.reshape(B, 2 * n).astype(jnp.float32)
    points = points.astype(jnp.float32)

    tb = tile_b if B > tile_b else max(128, _round_up(B, 128))
    B_pad = _round_up(B, tb)
    if B_pad != B:
        # Callers batching B to a multiple of tile_b avoid this pad copy entirely.
        state2 = jnp.pad(state2, ((0, B_pad - B), (0, 0)))
        points = jnp.pad(points, ((0, B_pad - B), (0, 0)))
    grid = B_pad // tb

    cost = pl.CostEstimate(
        flops=2 * B_pad * (n * H + H * H + H * A),
        transcendentals=B_pad * A,
        bytes_accessed=4 * (state2.size + points.size + A * B_pad)
        + 2 * w_slab.size + 4 * bias.size,
    )

    out = pl.pallas_call(
        functools.partial(_dqn_kernel, n_obs=n, hidden=H, n_actions=A,
                          batch=B, tile_b=tb),
        out_shape=jax.ShapeDtypeStruct((A, B_pad), jnp.float32),
        grid=(grid,),
        in_specs=[
            pl.BlockSpec((tb, 2 * n), lambda j: (j, 0)),
            pl.BlockSpec((tb, n), lambda j: (j, 0)),
            pl.BlockSpec(w_slab.shape, lambda j: (0, 0)),
            pl.BlockSpec(bias.shape, lambda j: (0, 0)),
        ],
        out_specs=pl.BlockSpec((A, B_pad), lambda j: (0, 0)),
        compiler_params=pltpu.CompilerParams(
            dimension_semantics=("arbitrary",),      # batch axis is the softmax reduction
            vmem_limit_bytes=32 * 1024 * 1024,
        ),
        cost_estimate=cost,
    )(state2, points, w_slab, bias)

    return out[:, :B].T   # (B, A), matching the PyTorch module's output layout


def init_params(key, n_observations=4, n_actions=1, hidden=128):
    """Deterministic PyTorch-style Linear init: W (out, in), b (out,)."""
    def linear(k, fan_in, fan_out):
        kw, kb = jax.random.split(k)
        bound = 1.0 / jnp.sqrt(jnp.float32(fan_in))
        w = jax.random.uniform(kw, (fan_out, fan_in), jnp.float32, -bound, bound)
        b = jax.random.uniform(kb, (fan_out,), jnp.float32, -bound, bound)
        return w, b

    k1, k2, k3 = jax.random.split(key, 3)
    w1, b1 = linear(k1, n_observations, hidden)
    w2, b2 = linear(k2, hidden, hidden)
    w3, b3 = linear(k3, hidden, n_actions)
    return {"w1": w1, "b1": b1, "w2": w2, "b2": b2, "w3": w3, "b3": b3}


def dqn_reference(state, points, p):
    """Pure-JAX reference mirroring the PyTorch forward."""
    x_ = state[:, 0] + state[:, 1] + points
    h1 = jnp.maximum(x_ @ p["w1"].T + p["b1"], 0.0)
    h2 = jnp.maximum(h1 @ p["w2"].T + p["b2"], 0.0)
    logits = h2 @ p["w3"].T + p["b3"]
    return jax.nn.softmax(logits, axis=0)


if __name__ == "__main__":
    key = jax.random.PRNGKey(0)
    k_state, k_points, k_params, k_state2, k_points2 = jax.random.split(key, 5)

    B, n_obs, n_actions, hidden = 16, 4, 1, 128
    state = jax.random.normal(k_state, (B, 2, n_obs), dtype=jnp.float32)
    points = jax.random.normal(k_points, (B, n_obs), dtype=jnp.float32)
    params = init_params(k_params, n_observations=n_obs, n_actions=n_actions,
                         hidden=hidden)
    w_slab, bias = pack_params(params)

    out = dqn_forward(state, points, w_slab, bias, n_actions=n_actions)
    out = jax.block_until_ready(out)
    ref = dqn_reference(state, points, params)
    assert out.shape == (B, n_actions), out.shape
    # bf16 MXU operands with f32 accumulation -> relaxed tolerance vs. f32 reference.
    assert jnp.allclose(out, ref, atol=2e-3, rtol=2e-2), (out, ref)
    # softmax over dim=0 -> each action column sums to 1 over the batch
    assert jnp.allclose(jnp.sum(out, axis=0), 1.0, atol=1e-3)

    # Multi-tile path: grid > 1, cross-tile softmax finalize + padded-lane masking.
    B2 = 300
    state_l = jax.random.normal(k_state2, (B2, 2, n_obs), dtype=jnp.float32)
    points_l = jax.random.normal(k_points2, (B2, n_obs), dtype=jnp.float32)
    out_l = jax.block_until_ready(
        dqn_forward(state_l, points_l, w_slab, bias, n_actions=n_actions,
                    tile_b=128))
    ref_l = dqn_reference(state_l, points_l, params)
    assert out_l.shape == (B2, n_actions), out_l.shape
    assert jnp.allclose(out_l, ref_l, atol=2e-3, rtol=2e-2), (out_l, ref_l)
    assert jnp.allclose(jnp.sum(out_l, axis=0), 1.0, atol=1e-3)

    print("KERNEL_OK")
</pallas_src>

<mosaic_0001>
module attributes {stable_mosaic.version = 11 : i64} {
  func.func @_dqn_kernel(%arg0: i32, %arg1: memref<128x8xf32, #tpu.memory_space<vmem>>, %arg2: memref<128x4xf32, #tpu.memory_space<vmem>>, %arg3: memref<128x384xbf16, #tpu.memory_space<vmem>>, %arg4: memref<128x3xf32, #tpu.memory_space<vmem>>, %arg5: memref<1x128xf32, #tpu.memory_space<vmem>>) attributes {dimension_semantics = [#tpu.dimension_semantics<arbitrary>], iteration_bounds = array<i64: 1>, scalar_prefetch = 0 : i64, scratch_operands = 0 : i64, tpu.core_type = #tpu.core_type<tc>, window_params = [{transform_indices = @transform_0, window_bounds = array<i64: 128, 8>}, {transform_indices = @transform_1, window_bounds = array<i64: 128, 4>}, {pipeline_mode = #tpu.pipeline_mode<synchronous>, transform_indices = @transform_2, window_bounds = array<i64: 128, 384>}, {pipeline_mode = #tpu.pipeline_mode<synchronous>, transform_indices = @transform_3, window_bounds = array<i64: 128, 3>}, {pipeline_mode = #tpu.pipeline_mode<synchronous>, transform_indices = @transform_4, window_bounds = array<i64: 1, 128>}]} {
    %c0 = arith.constant 0 : index
    %c0_0 = arith.constant 0 : index
    %0 = vector.load %arg3[%c0, %c0_0] : memref<128x384xbf16, #tpu.memory_space<vmem>>, vector<128x128xbf16>
    %c0_1 = arith.constant 0 : index
    %c128 = arith.constant 128 : index
    %1 = vector.load %arg3[%c0_1, %c128] : memref<128x384xbf16, #tpu.memory_space<vmem>>, vector<128x4xbf16>
    %c0_2 = arith.constant 0 : index
    %c256 = arith.constant 256 : index
    %2 = vector.load %arg3[%c0_2, %c256] : memref<128x384xbf16, #tpu.memory_space<vmem>>, vector<128x1xbf16>
    %c0_3 = arith.constant 0 : index
    %c0_4 = arith.constant 0 : index
    %3 = vector.load %arg4[%c0_3, %c0_4] : memref<128x3xf32, #tpu.memory_space<vmem>>, vector<128x1xf32>
    %c0_5 = arith.constant 0 : index
    %c1 = arith.constant 1 : index
    %4 = vector.load %arg4[%c0_5, %c1] : memref<128x3xf32, #tpu.memory_space<vmem>>, vector<128x1xf32>
    %c0_6 = arith.constant 0 : index
    %c2 = arith.constant 2 : index
    %5 = vector.load %arg4[%c0_6, %c2] : memref<128x3xf32, #tpu.memory_space<vmem>>, vector<1x1xf32>
    %c0_7 = arith.constant 0 : index
    %c0_8 = arith.constant 0 : index
    %6 = vector.load %arg1[%c0_7, %c0_8] : memref<128x8xf32, #tpu.memory_space<vmem>>, vector<128x8xf32>
    %7 = vector.extract_strided_slice %6 {offsets = [0, 0], sizes = [128, 4], strides = [1, 1]} : vector<128x8xf32> to vector<128x4xf32>
    %8 = vector.extract_strided_slice %6 {offsets = [0, 4], sizes = [128, 4], strides = [1, 1]} : vector<128x8xf32> to vector<128x4xf32>
    %9 = arith.addf %7, %8 : vector<128x4xf32>
    %c0_9 = arith.constant 0 : index
    %c0_10 = arith.constant 0 : index
    %10 = vector.load %arg2[%c0_9, %c0_10] : memref<128x4xf32, #tpu.memory_space<vmem>>, vector<128x4xf32>
    %11 = arith.addf %9, %10 : vector<128x4xf32>
    %12 = arith.truncf %11 : vector<128x4xf32> to vector<128x4xbf16>
    %cst = arith.constant dense<0.000000e+00> : vector<128x128xf32>
    %13 = tpu.matmul %1, %12, %cst {dimension_numbers = #tpu.dot_dimension_numbers<[1], [1], [0], [0], [0, 0, 1, 0], [], []>} : vector<128x4xbf16>, vector<128x4xbf16>, vector<128x128xf32> -> vector<128x128xf32>
    %14 = vector.broadcast %3 : vector<128x1xf32> to vector<128x128xf32>
    %15 = arith.addf %13, %14 : vector<128x128xf32>
    %cst_11 = arith.constant 0.000000e+00 : f32
    %16 = vector.broadcast %cst_11 : f32 to vector<128x128xf32>
    %17 = arith.maximumf %15, %16 : vector<128x128xf32>
    %18 = arith.truncf %17 : vector<128x128xf32> to vector<128x128xbf16>
    %cst_12 = arith.constant dense<0.000000e+00> : vector<128x128xf32>
    %19 = tpu.matmul %0, %18, %cst_12 {dimension_numbers = #tpu.dot_dimension_numbers<[1], [0], [0], [1], [0, 0, 1, 1], [], []>} : vector<128x128xbf16>, vector<128x128xbf16>, vector<128x128xf32> -> vector<128x128xf32>
    %20 = vector.broadcast %4 : vector<128x1xf32> to vector<128x128xf32>
    %21 = arith.addf %19, %20 : vector<128x128xf32>
    %cst_13 = arith.constant 0.000000e+00 : f32
    %22 = vector.broadcast %cst_13 : f32 to vector<128x128xf32>
    %23 = arith.maximumf %21, %22 : vector<128x128xf32>
    %24 = arith.truncf %23 : vector<128x128xf32> to vector<128x128xbf16>
    %cst_14 = arith.constant dense<0.000000e+00> : vector<1x128xf32>
    %25 = tpu.matmul %2, %24, %cst_14 {dimension_numbers = #tpu.dot_dimension_numbers<[0], [0], [1], [1], [0, 1, 1, 1], [], []>} : vector<128x1xbf16>, vector<128x128xbf16>, vector<1x128xf32> -> vector<1x128xf32>
    %26 = vector.broadcast %5 : vector<1x1xf32> to vector<1x128xf32>
    %27 = arith.addf %25, %26 : vector<1x128xf32>
    %c128_i32 = arith.constant 128 : i32
    %28 = arith.muli %arg0, %c128_i32 : i32
    %29 = tpu.assume_multiple %28, 128 : i32
    %c0_15 = arith.constant 0 : index
    %30 = arith.index_cast %29 : i32 to index
    %31 = vector.load %arg5[%c0_15, %30] : memref<1x128xf32, #tpu.memory_space<vmem>>, vector<1x128xf32>
    tpu.vector_store %arg5[%c0_15, %30], %27 {strides = array<i32>} : memref<1x128xf32, #tpu.memory_space<vmem>>, vector<1x128xf32>,
    %c0_i32 = arith.constant 0 : i32
    %32 = arith.cmpi eq, %arg0, %c0_i32 : i32
    %33 = arith.extui %32 : i1 to i32
    %c0_i32_16 = arith.constant 0 : i32
    %34 = arith.cmpi ne, %33, %c0_i32_16 : i32
    scf.if %34 {
      %c0_17 = arith.constant 0 : index
      %c0_18 = arith.constant 0 : index
      %35 = vector.load %arg5[%c0_17, %c0_18] : memref<1x128xf32, #tpu.memory_space<vmem>>, vector<1x128xf32>
      %36 = tpu.iota {dimensions = array<i32: 1>} : vector<1x128xi32>
      %c16_i32 = arith.constant 16 : i32
      %37 = vector.broadcast %c16_i32 : i32 to vector<1x128xi32>
      %38 = arith.cmpi slt, %36, %37 : vector<1x128xi32>
      %cst_19 = arith.constant 0xFF800000 : f32
      %39 = vector.broadcast %cst_19 : f32 to vector<1x128xf32>
      %40 = arith.select %38, %35, %39 : vector<1x128xi1>, vector<1x128xf32>
      %cst_20 = arith.constant dense<0xFF800000> : vector<1xf32>
      %41 = vector.multi_reduction <maximumf>, %40, %cst_20 [1] : vector<1x128xf32> to vector<1xf32>
      %42 = vector.shape_cast %41 : vector<1xf32> to vector<1x1xf32>
      %43 = vector.broadcast %42 : vector<1x1xf32> to vector<1x128xf32>
      %44 = arith.subf %40, %43 : vector<1x128xf32>
      %45 = math.exp %44 : vector<1x128xf32>
      %cst_21 = arith.constant dense<0.000000e+00> : vector<1xf32>
      %46 = vector.multi_reduction <add>, %45, %cst_21 [1] : vector<1x128xf32> to vector<1xf32>
      %47 = vector.shape_cast %46 : vector<1xf32> to vector<1x1xf32>
      %48 = tpu.reciprocal %47 {approx = true} : vector<1x1xf32> -> vector<1x1xf32>
      %49 = arith.mulf %47, %48 : vector<1x1xf32>
      %cst_22 = arith.constant 2.000000e+00 : f32
      %50 = vector.broadcast %cst_22 : f32 to vector<1x1xf32>
      %51 = arith.subf %50, %49 : vector<1x1xf32>
      %52 = arith.mulf %48, %51 : vector<1x1xf32>
      %53 = vector.broadcast %52 : vector<1x1xf32> to vector<1x128xf32>
      %54 = arith.mulf %45, %53 : vector<1x128xf32>
      %c0_23 = arith.constant 0 : index
      %c0_24 = arith.constant 0 : index
      %55 = vector.load %arg5[%c0_23, %c0_24] : memref<1x128xf32, #tpu.memory_space<vmem>>, vector<1x128xf32>
      tpu.vector_store %arg5[%c0_23, %c0_24], %54 {strides = array<i32>} : memref<1x128xf32, #tpu.memory_space<vmem>>, vector<1x128xf32>,
    } else {
    }
    return
  }
  func.func @transform_0(%arg0: i32) -> (i32, i32) {
    %c0_i32 = arith.constant 0 : i32
    %c0_i32_0 = arith.constant 0 : i32
    return %arg0, %c0_i32 : i32, i32
  }
  func.func @transform_1(%arg0: i32) -> (i32, i32) {
    %c0_i32 = arith.constant 0 : i32
    %c0_i32_0 = arith.constant 0 : i32
    return %arg0, %c0_i32 : i32, i32
  }
  func.func @transform_2(%arg0: i32) -> (i32, i32) {
    %c0_i32 = arith.constant 0 : i32
    %c0_i32_0 = arith.constant 0 : i32
    %c0_i32_1 = arith.constant 0 : i32
    return %c0_i32, %c0_i32_0 : i32, i32
  }
  func.func @transform_3(%arg0: i32) -> (i32, i32) {
    %c0_i32 = arith.constant 0 : i32
    %c0_i32_0 = arith.constant 0 : i32
    %c0_i32_1 = arith.constant 0 : i32
    return %c0_i32, %c0_i32_0 : i32, i32
  }
  func.func @transform_4(%arg0: i32) -> (i32, i32) {
    %c0_i32 = arith.constant 0 : i32
    %c0_i32_0 = arith.constant 0 : i32
    %c0_i32_1 = arith.constant 0 : i32
    return %c0_i32, %c0_i32_0 : i32, i32
  }
}

</mosaic_0001>

<bundles_post_ra>
// kernel: dqn_forward.1
= control target key start
LH: loop header
LB: loop body
LE: loop exit
PB: predicated region body
PF: predicated region fallthrough
CT: control target
= control target key end

     0   :  { %s1091_s19 = smov 124   ;;  %vm339_vm0 = vcmask 31744   ;;  %v1092_v17 = vmov 0   ;;  %vm1095_vm1 = vmmov 0   ;;  %vm865_vm3 = vcmask 1040384   ;;  %s1511_s0 = inlined_call_operand.vmem [shape: f32[128,8], index: 0, kind: input, shape index: {}]   ;;  %s1512_s2 = inlined_call_operand.vmem [shape: bf16[128,384], index: 2, kind: input, shape index: {}]   ;;  %s1513_s3 = inlined_call_operand.vmem [shape: f32[128,3], index: 3, kind: input, shape index: {}]   ;;  %s1514_s1 = inlined_call_operand.vmem [shape: f32[128,4], index: 1, kind: input, shape index: {}]   ;;  %s1515_s4 = inlined_call_operand.vmem [shape: f32[1,128], index: 4, kind: output, shape index: {}]  }
   0x1   :  { %v1125_v0 = vld [vmem:[%s1511_s0] sm:$0xff]  ;;  %v1130_v1 = vld [vmem:[%s1511_s0 + $0x10] sm:$0xff]  ;;  %v1137_v2 = vld [vmem:[%s1511_s0 + $0x8] sm:$0xff]  ;;  %1058 = vset.pattern.permute.xlu1 %v1092_v17  ;;  %1057 = vset.pattern.permute.xlu0 %v1092_v17 }
   0x2   :  { %115 = vrot.lane.b32.xlu0 %v1125_v0, %s1091_s19  ;;  %119 = vrot.lane.b32.xlu1 %v1130_v1, %s1091_s19  ;;  %v1142_v3 = vld [vmem:[%s1511_s0 + $0x18] sm:$0xff]  ;;  %v1149_v4 = vld [vmem:[%s1511_s0 + $0x28] sm:$0xff] }
   0x3   :  { %v1154_v5 = vld [vmem:[%s1511_s0 + $0x20] sm:$0xff]  ;;  %v1161_v6 = vld [vmem:[%s1511_s0 + $0x38] sm:$0xff]  ;;  %v1166_v7 = vld [vmem:[%s1511_s0 + $0x30] sm:$0xff] }
   0x4   :  { %v1173_v8 = vld [vmem:[%s1511_s0 + $0x48] sm:$0xff]  ;;  %v1178_v9 = vld [vmem:[%s1511_s0 + $0x40] sm:$0xff]  ;;  %v1185_v10 = vld [vmem:[%s1511_s0 + $0x58] sm:$0xff] }
   0x5   :  { %v1190_v11 = vld [vmem:[%s1511_s0 + $0x50] sm:$0xff]  ;;  %v1197_v12 = vld [vmem:[%s1511_s0 + $0x68] sm:$0xff]  ;;  %v1202_v13 = vld [vmem:[%s1511_s0 + $0x60] sm:$0xff] }
   0x6   :  { %117 = vrot.lane.b32.xlu0 %v1137_v2, %s1091_s19  ;;  %121 = vrot.lane.b32.xlu1 %v1142_v3, %s1091_s19  ;;  %v1209_v14 = vld [vmem:[%s1511_s0 + $0x78] sm:$0xff]  ;;  %v1214_v15 = vld [vmem:[%s1511_s0 + $0x70] sm:$0xff] }
   0x7   :  { %v1063_v16 = vld [vmem:[%s1512_s2 + $0x4] ss:$12 sps:$4 sm:$0xff]   ;;  %v1225_v18 = vld [vmem:[%s1513_s3 + $0x8] sm:$0xff]  ;;  %v1242_v21 = vld [vmem:[%s1513_s3 + $0x18] sm:$0xff] }
   0x8   :  { %975 = vmatprep.mubr.msk.bf16.mxu0 %vm339_vm0, %v1063_v16  ;;  %v1230_v19 = vld [vmem:[%s1513_s3] sm:$0xff]  ;;  %v1237_v20 = vld [vmem:[%s1513_s3 + $0x10] sm:$0xff]  ;;  %v1254_v23 = vld [vmem:[%s1513_s3 + $0x28] sm:$0xff] }
   0x9   :  { %v1249_v22 = vld [vmem:[%s1513_s3 + $0x20] sm:$0xff]  ;;  %v1261_v24 = vld [vmem:[%s1513_s3 + $0x30] sm:$0xff]  ;;  %v1266_v25 = vld [vmem:[%s1513_s3 + $0x38] sm:$0xff] }
   0xa   :  { %125 = vrot.lane.b32.xlu1 %v1149_v4, %s1091_s19  ;;  %123 = vrot.lane.b32.xlu0 %v1154_v5, %s1091_s19  ;;  %v1273_v26 = vld [vmem:[%s1513_s3 + $0x40] sm:$0xff]  ;;  %v1278_v27 = vld [vmem:[%s1513_s3 + $0x48] sm:$0xff] }
   0xb   :  { %v1285_v28 = vld [vmem:[%s1513_s3 + $0x50] sm:$0xff]  ;;  %v1290_v29 = vld [vmem:[%s1513_s3 + $0x58] sm:$0xff]  ;;  %v1297_v30 = vld [vmem:[%s1513_s3 + $0x60] sm:$0xff] }
   0xc   :  { %v1302_v31 = vld [vmem:[%s1513_s3 + $0x68] sm:$0xff]  ;;  %v1309_v32 = vld [vmem:[%s1513_s3 + $0x70] sm:$0xff]  ;;  %v1314_v33 = vld [vmem:[%s1513_s3 + $0x78] sm:$0xff] }
   0xd   :  { %v181_v37 = vld [vmem:[%s1514_s1 + $0x10] sm:$0xff]  ;;  %v179_v39 = vld [vmem:[%s1514_s1] sm:$0xff]  ;;  %v180_v40 = vld [vmem:[%s1514_s1 + $0x8] sm:$0xff] }
   0xe   :  { %129 = vrot.lane.b32.xlu1 %v1161_v6, %s1091_s19  ;;  %127 = vrot.lane.b32.xlu0 %v1166_v7, %s1091_s19  ;;  %v182_v42 = vld [vmem:[%s1514_s1 + $0x18] sm:$0xff]  ;;  %v184_v56 = vld [vmem:[%s1514_s1 + $0x28] sm:$0xff] }
   0xf   :  { %v183_v57 = vld [vmem:[%s1514_s1 + $0x20] sm:$0xff] }
  0x12   :  { %133 = vrot.lane.b32.xlu1 %v1173_v8, %s1091_s19  ;;  %131 = vrot.lane.b32.xlu0 %v1178_v9, %s1091_s19 }
  0x16   :  { %137 = vrot.lane.b32.xlu1 %v1185_v10, %s1091_s19  ;;  %135 = vrot.lane.b32.xlu0 %v1190_v11, %s1091_s19 }
  0x1a   :  { %141 = vrot.lane.b32.xlu1 %v1197_v12, %s1091_s19  ;;  %139 = vrot.lane.b32.xlu0 %v1202_v13, %s1091_s19 }
  0x1e   :  { %145 = vrot.lane.b32.xlu1 %v1209_v14, %s1091_s19  ;;  %143 = vrot.lane.b32.xlu0 %v1214_v15, %s1091_s19 }
  0x22   :  { %226 = vperm.xlu1 %1058, %v1225_v18   ;;  %221 = vperm.xlu0 %1057, %v1230_v19  }
  0x26   :  { %231 = vperm.xlu1 %1058, %v1237_v20   ;;  %236 = vperm.xlu0 %1057, %v1242_v21  }
  0x2a   :  { %241 = vperm.xlu1 %1058, %v1249_v22   ;;  %246 = vperm.xlu0 %1057, %v1254_v23  }
  0x2e   :  { %251 = vperm.xlu1 %1058, %v1261_v24   ;;  %256 = vperm.xlu0 %1057, %v1266_v25  }
  0x32   :  { %261 = vperm.xlu1 %1058, %v1273_v26   ;;  %266 = vperm.xlu0 %1057, %v1278_v27  }
  0x36   :  { %271 = vperm.xlu1 %1058, %v1285_v28   ;;  %276 = vperm.xlu0 %1057, %v1290_v29  }
  0x3a   :  { %281 = vperm.xlu1 %1058, %v1297_v30   ;;  %286 = vperm.xlu0 %1057, %v1302_v31  }
  0x3e   :  { %291 = vperm.xlu1 %1058, %v1309_v32   ;;  %296 = vperm.xlu0 %1057, %v1314_v33  }
  0x74   :  { %v116_v34 = vpop.permute.xlu0 %115  ;;  %v120_v35 = vpop.permute.xlu1 %119 }
  0x75   :  { %v165_v36 = vadd.f32 %v120_v35, %v1130_v1  ;;  %v163_v38 = vadd.f32 %v116_v34, %v1125_v0 }
  0x77   :  { %v197_v44 = vadd.f32 %v181_v37, %v165_v36  ;;  %v195_v47 = vadd.f32 %v179_v39, %v163_v38  ;;  %v188_v37 = vld [vmem:[%s1514_s1 + $0x48] sm:$0xff]  ;;  %v187_v38 = vld [vmem:[%s1514_s1 + $0x40] sm:$0xff] }
  0x78   :  { %v118_v41 = vpop.permute.xlu0 %117  ;;  %v122_v43 = vpop.permute.xlu1 %121 }
  0x79   :  { %v164_v45 = vadd.f32 %v118_v41, %v1137_v2  ;;  %v166_v46 = vadd.f32 %v122_v43, %v1142_v3  ;;  %v186_v2 = vld [vmem:[%s1514_s1 + $0x38] sm:$0xff]  ;;  %v185_v3 = vld [vmem:[%s1514_s1 + $0x30] sm:$0xff] }
  0x7b   :  { %v196_v48 = vadd.f32 %v180_v40, %v164_v45  ;;  %v198_v49 = vadd.f32 %v182_v42, %v166_v46  ;;  %v190_v45 = vld [vmem:[%s1514_s1 + $0x58] sm:$0xff]  ;;  %v189_v46 = vld [vmem:[%s1514_s1 + $0x50] sm:$0xff] }
  0x7c   :  { %v126_v50 = vpop.permute.xlu1 %125  ;;  %v124_v51 = vpop.permute.xlu0 %123 }
  0x7d   :  { %v212_v52 = vpack.c.bf16 %v198_v49, %v197_v44  ;;  %v211_v53 = vpack.c.bf16 %v196_v48, %v195_v47  ;;  %v168_v54 = vadd.f32 %v126_v50, %v1149_v4  ;;  %v167_v55 = vadd.f32 %v124_v51, %v1154_v5 }
  0x7f   :  { %1043 = vmatprep.subr.msk.bf16.mxu0 %vm339_vm0, %v211_v53  ;;  %v365_v58 = vsel %vm339_vm0, %v211_v53, 0  ;;  %v200_v59 = vadd.f32 %v184_v56, %v168_v54  ;;  %v199_v60 = vadd.f32 %v183_v57, %v167_v55  ;;  %v368_v4 = vsel %vm339_vm0, %v212_v52, 0  ;;  %v192_v53 = vld [vmem:[%s1514_s1 + $0x68] sm:$0xff]  ;;  %v191_v54 = vld [vmem:[%s1514_s1 + $0x60] sm:$0xff] }
  0x80   :  { %960 = vmatpush3.bf16.xpose.msra.mxu0 %v365_v58  ;;  %v130_v61 = vpop.permute.xlu1 %129  ;;  %v128_v62 = vpop.permute.xlu0 %127 }
  0x81   :  { %1044 = vmatprep.subr.msk.bf16.mxu0 %vm339_vm0, %v212_v52  ;;  %v213_v63 = vpack.c.bf16 %v200_v59, %v199_v60  ;;  %v170_v0 = vadd.f32 %v130_v61, %v1161_v6  ;;  %v169_v1 = vadd.f32 %v128_v62, %v1166_v7  ;;  %v194_v61 = vld [vmem:[%s1514_s1 + $0x78] sm:$0xff]  ;;  %v193_v62 = vld [vmem:[%s1514_s1 + $0x70] sm:$0xff] }
  0x83   :  { %v202_v5 = vadd.f32 %v186_v2, %v170_v0  ;;  %v201_v16 = vadd.f32 %v185_v3, %v169_v1  ;;  %v371_v6 = vsel %vm339_vm0, %v213_v63, 0  ;;  %v1065_v3 = vld [vmem:[%s1512_s2 + $0x34] ss:$12 sps:$4 sm:$0xff]  }
  0x84   :  { %v134_v17 = vpop.permute.xlu1 %133  ;;  %v132_v34 = vpop.permute.xlu0 %131 }
  0x85   :  { %v214_v7 = vpack.c.bf16 %v202_v5, %v201_v16  ;;  %v172_v35 = vadd.f32 %v134_v17, %v1173_v8  ;;  %v171_v36 = vadd.f32 %v132_v34, %v1178_v9  ;;  %v1067_v5 = vld [vmem:[%s1512_s2 + $0x64] ss:$12 sps:$4 sm:$0xff]   ;;  %v1068_v16 = vld [vmem:[%s1512_s2 + $0x7c] ss:$12 sps:$4 sm:$0xff]   ;;  %v1069_v17 = vld [vmem:[%s1512_s2 + $0x94] ss:$12 sps:$4 sm:$0xff]  }
  0x86   :  { %v1070_v34 = vld [vmem:[%s1512_s2 + $0xac] ss:$12 sps:$4 sm:$0xff]  }
  0x87   :  { %v204_v39 = vadd.f32 %v188_v37, %v172_v35  ;;  %v203_v40 = vadd.f32 %v187_v38, %v171_v36  ;;  %v374_v43 = vsel %vm339_vm0, %v214_v7, 0  ;;  %v1082_v35 = vld [vmem:[%s1512_s2 + $0x50] ss:$12 sps:$4 sm:$0xff]  }
  0x88   :  { %962 = vmatpush3.bf16.xpose.msra.mxu0 %v368_v4  ;;  %v138_v41 = vpop.permute.xlu1 %137  ;;  %v136_v42 = vpop.permute.xlu0 %135  ;;  %v1066_v4 = vld [vmem:[%s1512_s2 + $0x4c] ss:$12 sps:$4 sm:$0xff]  }
  0x89   :  { %1045 = vmatprep.subr.msk.bf16.mxu0 %vm339_vm0, %v213_v63  ;;  %v215_v8 = vpack.c.bf16 %v204_v39, %v203_v40  ;;  %v174_v9 = vadd.f32 %v138_v41, %v1185_v10  ;;  %v173_v44 = vadd.f32 %v136_v42, %v1190_v11 }
  0x8b   :  { %v206_v47 = vadd.f32 %v190_v45, %v174_v9  ;;  %v205_v48 = vadd.f32 %v189_v46, %v173_v44  ;;  %v377_v51 = vsel %vm339_vm0, %v215_v8, 0 }
  0x8c   :  { %v142_v49 = vpop.permute.xlu1 %141  ;;  %v140_v50 = vpop.permute.xlu0 %139 }
  0x8d   :  { %v216_v10 = vpack.c.bf16 %v206_v47, %v205_v48  ;;  %v176_v11 = vadd.f32 %v142_v49, %v1197_v12  ;;  %v175_v52 = vadd.f32 %v140_v50, %v1202_v13 }
  0x8f   :  { %v208_v55 = vadd.f32 %v192_v53, %v176_v11  ;;  %v207_v56 = vadd.f32 %v191_v54, %v175_v52  ;;  %v380_v59 = vsel %vm339_vm0, %v216_v10, 0 }
  0x90   :  { %964 = vmatpush3.bf16.xpose.msra.mxu0 %v371_v6  ;;  %v146_v57 = vpop.permute.xlu1 %145  ;;  %v144_v58 = vpop.permute.xlu0 %143  ;;  %v1071_v6 = vld [vmem:[%s1512_s2] ss:$12 sps:$4 sm:$0xff]  }
  0x91   :  { %1046 = vmatprep.subr.msk.bf16.mxu0 %vm339_vm0, %v214_v7  ;;  %v217_v12 = vpack.c.bf16 %v208_v55, %v207_v56  ;;  %v178_v13 = vadd.f32 %v146_v57, %v1209_v14  ;;  %v177_v60 = vadd.f32 %v144_v58, %v1214_v15  ;;  %v1064_v15 = vld [vmem:[%s1512_s2 + $0x1c] ss:$12 sps:$4 sm:$0xff]   ;;  %1007 = vmatprep.mubr.bf16.mxu1 %v1071_v6  ;;  %v1093_v7 = vmov 1  }
  0x92   :  { %1059 = vset.pattern.permute.xlu1 %v1093_v7  ;;  %1060 = vset.pattern.permute.xlu0 %v1093_v7 }
  0x93   :  { %v210_v63 = vadd.f32 %v194_v61, %v178_v13  ;;  %v209_v0 = vadd.f32 %v193_v62, %v177_v60  ;;  %v383_v1 = vsel %vm339_vm0, %v217_v12, 0  ;;  %510 = vperm.xlu1 %1059, %v1230_v19   ;;  %514 = vperm.xlu0 %1060, %v1225_v18  }
  0x95   :  { %v218_v2 = vpack.c.bf16 %v210_v63, %v209_v0 }
  0x97   :  { %v386_v14 = vsel %vm339_vm0, %v218_v2, 0  ;;  %518 = vperm.xlu1 %1059, %v1237_v20   ;;  %526 = vperm.xlu0 %1060, %v1249_v22   ;;  %v1079_v22 = vld [vmem:[%s1512_s2 + $0x8] ss:$12 sps:$4 sm:$0xff]  }
  0x98   :  { %966 = vmatpush3.bf16.xpose.msra.mxu0 %v374_v43 }
  0x99   :  { %1047 = vmatprep.subr.msk.bf16.mxu0 %vm339_vm0, %v215_v8  ;;  %v1083_v8 = vld [vmem:[%s1512_s2 + $0x68] ss:$12 sps:$4 sm:$0xff]  }
  0x9b   :  { %522 = vperm.xlu1 %1059, %v1242_v21   ;;  %534 = vperm.xlu0 %1060, %v1261_v24   ;;  %v1080_v24 = vld [vmem:[%s1512_s2 + $0x20] ss:$12 sps:$4 sm:$0xff]  }
  0x9f   :  { %530 = vperm.xlu1 %1059, %v1254_v23   ;;  %542 = vperm.xlu0 %1060, %v1273_v26   ;;  %v1081_v26 = vld [vmem:[%s1512_s2 + $0x38] ss:$12 sps:$4 sm:$0xff]  }
  0xa0   :  { %968 = vmatpush3.bf16.xpose.msra.mxu0 %v377_v51  ;;  %v1084_v51 = vld [vmem:[%s1512_s2 + $0x80] ss:$12 sps:$4 sm:$0xff]  }
  0xa1   :  { %1048 = vmatprep.subr.msk.bf16.mxu0 %vm339_vm0, %v216_v10  ;;  %v227_v18 = vpop.permute.xlu1 %226  ;;  %v222_v19 = vpop.permute.xlu0 %221 }
  0xa3   :  { %538 = vperm.xlu1 %1059, %v1266_v25   ;;  %550 = vperm.xlu0 %1060, %v1285_v28  }
  0xa5   :  { %v232_v20 = vpop.permute.xlu1 %231  ;;  %v237_v21 = vpop.permute.xlu0 %236 }
  0xa7   :  { %546 = vperm.xlu1 %1059, %v1278_v27   ;;  %558 = vperm.xlu0 %1060, %v1297_v30  }
  0xa8   :  { %970 = vmatpush3.bf16.xpose.msra.mxu0 %v380_v59  ;;  %v1085_v59 = vld [vmem:[%s1512_s2 + $0x98] ss:$12 sps:$4 sm:$0xff]  }
  0xa9   :  { %1049 = vmatprep.subr.msk.bf16.mxu0 %vm339_vm0, %v217_v12  ;;  %v242_v23 = vpop.permute.xlu1 %241  ;;  %v247_v25 = vpop.permute.xlu0 %246 }
  0xab   :  { %554 = vperm.xlu1 %1059, %v1290_v29   ;;  %566 = vperm.xlu0 %1060, %v1309_v32  }
  0xad   :  { %v252_v27 = vpop.permute.xlu1 %251 }
  0xaf   :  { %562 = vperm.xlu1 %1059, %v1302_v31   ;;  %v257_v31 = vpop.permute.xlu0 %256 }
  0xb0   :  { %972 = vmatpush3.bf16.xpose.msra.mxu0 %v383_v1 }
  0xb1   :  { %1050 = vmatprep.subr.msk.bf16.mxu0 %vm339_vm0, %v218_v2  ;;  %v262_v41 = vpop.permute.xlu1 %261  ;;  %v1086_v2 = vld [vmem:[%s1512_s2 + $0xb0] ss:$12 sps:$4 sm:$0xff]  }
  0xb3   :  { %570 = vperm.xlu1 %1059, %v1314_v33   ;;  %v267_v44 = vpop.permute.xlu0 %266 }
  0xb5   :  { %v272_v52 = vpop.permute.xlu1 %271 }
  0xb7   :  { %v277_v56 = vpop.permute.xlu0 %276 }
  0xb8   :  { %974 = vmatpush3.bf16.xpose.msra.mxu0 %v386_v14 }
  0xb9   :  { %v282_v63 = vpop.permute.xlu1 %281 }
  0xbd   :  { %v292_v7 = vpop.permute.xlu1 %291 }
  0xbf   :  { %976 = vmatmul.mubr.msk.bf16.vlgmr.msra.gmra.mrb[0].mxu0 %vm339_vm0, %v1064_v15 }
  0xc0   :  { %979 = vmatprep.mubr.msk.bf16.mxu0 %vm339_vm0, %v1065_v3  ;;  %v287_v3 = vpop.permute.xlu0 %286 }
  0xc7   :  { %980 = vmatmul.mubr.msk.bf16.gmra.mrb[4].mxu0 %vm339_vm0, %v1066_v4 }
  0xc8   :  { %983 = vmatprep.mubr.msk.bf16.mxu0 %vm339_vm0, %v1067_v5 }
  0xc9   :  { %795 = vxpose.xlu0.c.b16.start [1/8] (narrow) %v1079_v22, 16  ;;  %v297_v22 = vpop.permute.xlu0 %296 }
  0xcd   :  { %796 = vxpose.xlu0.c.b16.cont [2/8] (narrow) %v1080_v24, 16 }
  0xcf   :  { %984 = vmatmul.mubr.msk.bf16.gmra.mrb[8].mxu0 %vm339_vm0, %v1068_v16 }
  0xd0   :  { %987 = vmatprep.mubr.msk.bf16.mxu0 %vm339_vm0, %v1069_v17 }
  0xd1   :  { %797 = vxpose.xlu0.c.b16.cont [3/8] (narrow) %v1081_v26, 16 }
  0xd5   :  { %798 = vxpose.xlu0.c.b16.cont [4/8] (narrow) %v1082_v35, 16  ;;  %v1072_v35 = vld [vmem:[%s1512_s2 + $0x18] ss:$12 sps:$4 sm:$0xff]  }
  0xd7   :  { %988 = vmatmul.mubr.msk.bf16.gmra.mrb[12].mxu0 %vm339_vm0, %v1070_v34 }
  0xd9   :  { %799 = vxpose.xlu0.c.b16.cont [5/8] (narrow) %v1083_v8, 16  ;;  %v1096_v8 = vmov 2  }
  0xda   :  { %1061 = vset.pattern.permute.xlu1 %v1096_v8 }
  0xdd   :  { %800 = vxpose.xlu0.c.b16.cont [6/8] (narrow) %v1084_v51, 16 }
  0xe1   :  { %801 = vxpose.xlu0.c.b16.cont [7/8] (narrow) %v1085_v59, 16 }
  0xe5   :  { %802 = vxpose.xlu0.c.b16.end [8/8] (narrow) %v1086_v2, 16 }
  0xee   :  { %1062 = vset.pattern.permute.xlu0 %v1096_v8 }
 0x192   :  { %v977_v28 = vpop.f32.mrb[0].mxu0 }
 0x193   :  { %v431_v29 = vadd.f32 %v977_v28, %v232_v20  ;;  %v422_v30 = vpop.f32.mrb[1].mxu0 }
 0x194   :  { %v423_v32 = vadd.f32 %v422_v30, %v222_v19  ;;  %v978_v33 = vpop.f32.mrb[2].mxu0 }
 0x195   :  { %v434_v36 = vadd.f32 %v978_v33, %v237_v21  ;;  %v425_v37 = vpop.f32.mrb[3].mxu0  ;;  %v487_v39 = vmax.f32 %v431_v29, 0.0 }
 0x196   :  { %v426_v38 = vadd.f32 %v425_v37, %v227_v18  ;;  %v485_v42 = vmax.f32 %v423_v32, 0.0  ;;  %v1074_v37 = vld [vmem:[%s1512_s2 + $0x48] ss:$12 sps:$4 sm:$0xff]  }
 0x197   :  { %v488_v40 = vmax.f32 %v434_v36, 0.0  ;;  %v1073_v36 = vld [vmem:[%s1512_s2 + $0x30] ss:$12 sps:$4 sm:$0xff]  }
 0x198   :  { %v486_v43 = vmax.f32 %v426_v38, 0.0  ;;  %v1075_v38 = vld [vmem:[%s1512_s2 + $0x60] ss:$12 sps:$4 sm:$0xff]  }
 0x199   :  { %v502_v9 = vpack.c.bf16 %v488_v40, %v487_v39  ;;  %v1076_v39 = vld [vmem:[%s1512_s2 + $0x78] ss:$12 sps:$4 sm:$0xff]   ;;  %v1077_v40 = vld [vmem:[%s1512_s2 + $0x90] ss:$12 sps:$4 sm:$0xff]  }
 0x19a   :  { %v981_v45 = vpop.f32.mrb[4].mxu0  ;;  %v501_v46 = vpack.c.bf16 %v486_v43, %v485_v42  ;;  %v1094_v42 = vmov 0.0   ;;  %v82_v43 = vld [vmem:[%s1513_s3] sm:$0x1] }
 0x19b   :  { %v447_v47 = vadd.f32 %v981_v45, %v252_v27  ;;  %v438_v48 = vpop.f32.mrb[5].mxu0  ;;  %744 = vperm.xlu1 %1061, %v82_v43   ;;  %v515_v45 = vpop.permute.xlu0 %514 }
 0x19c   :  { %v439_v49 = vadd.f32 %v438_v48, %v242_v23  ;;  %v982_v50 = vpop.f32.mrb[6].mxu0  ;;  %991 = vmatprep.subr.bf16.mxu1 %v501_v46 }
 0x19d   :  { %v450_v10 = vadd.f32 %v982_v50, %v257_v31  ;;  %v441_v11 = vpop.f32.mrb[7].mxu0  ;;  %992 = vmatpush3.bf16.msra.mxu1 %v501_v46  ;;  %v491_v54 = vmax.f32 %v447_v47, 0.0 }
 0x19e   :  { %v442_v53 = vadd.f32 %v441_v11, %v247_v25  ;;  %993 = vmatprep.subr.bf16.mxu1 %v502_v9  ;;  %v489_v57 = vmax.f32 %v439_v49, 0.0 }
 0x19f   :  { %v492_v55 = vmax.f32 %v450_v10, 0.0  ;;  %v527_v47 = vpop.permute.xlu0 %526 }
 0x1a0   :  { %v490_v58 = vmax.f32 %v442_v53, 0.0 }
 0x1a1   :  { %v504_v12 = vpack.c.bf16 %v492_v55, %v491_v54  ;;  %994 = vmatpush3.bf16.msra.mxu1 %v502_v9  ;;  %v511_v9 = vpop.permute.xlu1 %510 }
 0x1a2   :  { %v503_v13 = vpack.c.bf16 %v490_v58, %v489_v57  ;;  %v985_v60 = vpop.f32.mrb[8].mxu0 }
 0x1a3   :  { %v463_v61 = vadd.f32 %v985_v60, %v272_v52  ;;  %v454_v62 = vpop.f32.mrb[9].mxu0  ;;  %v535_v49 = vpop.permute.xlu0 %534 }
 0x1a4   :  { %v455_v0 = vadd.f32 %v454_v62, %v262_v41  ;;  %v986_v1 = vpop.f32.mrb[10].mxu0  ;;  %995 = vmatprep.subr.bf16.mxu1 %v503_v13  ;;  %v1078_v41 = vld [vmem:[%s1512_s2 + $0xa8] ss:$12 sps:$4 sm:$0xff]  }
 0x1a5   :  { %v466_v14 = vadd.f32 %v986_v1, %v277_v56  ;;  %v457_v15 = vpop.f32.mrb[11].mxu0  ;;  %996 = vmatpush3.bf16.msra.mxu1 %v503_v13  ;;  %v495_v5 = vmax.f32 %v463_v61, 0.0 }
 0x1a6   :  { %v458_v4 = vadd.f32 %v457_v15, %v267_v44  ;;  %997 = vmatprep.subr.bf16.mxu1 %v504_v12  ;;  %v493_v17 = vmax.f32 %v455_v0, 0.0  ;;  %v519_v44 = vpop.permute.xlu1 %518 }
 0x1a7   :  { %v496_v16 = vmax.f32 %v466_v14, 0.0  ;;  %v543_v59 = vpop.permute.xlu0 %542 }
 0x1a8   :  { %v494_v34 = vmax.f32 %v458_v4, 0.0 }
 0x1a9   :  { %v506_v6 = vpack.c.bf16 %v496_v16, %v495_v5  ;;  %998 = vmatpush3.bf16.msra.mxu1 %v504_v12 }
 0x1aa   :  { %v505_v18 = vpack.c.bf16 %v494_v34, %v493_v17  ;;  %v989_v19 = vpop.f32.mrb[12].mxu0  ;;  %v523_v46 = vpop.permute.xlu1 %522 }
 0x1ab   :  { %v479_v20 = vadd.f32 %v989_v19, %v292_v7  ;;  %v470_v21 = vpop.f32.mrb[13].mxu0  ;;  %v551_v4 = vpop.permute.xlu0 %550 }
 0x1ac   :  { %v471_v23 = vadd.f32 %v470_v21, %v282_v63  ;;  %v990_v24 = vpop.f32.mrb[14].mxu0  ;;  %999 = vmatprep.subr.bf16.mxu1 %v505_v18 }
 0x1ad   :  { %v482_v25 = vadd.f32 %v990_v24, %v297_v22  ;;  %v473_v26 = vpop.f32.mrb[15].mxu0  ;;  %1000 = vmatpush3.bf16.msra.mxu1 %v505_v18  ;;  %v499_v28 = vmax.f32 %v479_v20, 0.0 }
 0x1ae   :  { %v474_v27 = vadd.f32 %v473_v26, %v287_v3  ;;  %1001 = vmatprep.subr.bf16.mxu1 %v506_v6  ;;  %v497_v30 = vmax.f32 %v471_v23, 0.0  ;;  %v531_v48 = vpop.permute.xlu1 %530 }
 0x1af   :  { %v500_v29 = vmax.f32 %v482_v25, 0.0  ;;  %v559_v23 = vpop.permute.xlu0 %558 }
 0x1b0   :  { %v498_v31 = vmax.f32 %v474_v27, 0.0 }
 0x1b1   :  { %v508_v32 = vpack.c.bf16 %v500_v29, %v499_v28  ;;  %1002 = vmatpush3.bf16.msra.mxu1 %v506_v6 }
 0x1b2   :  { %v507_v33 = vpack.c.bf16 %v498_v31, %v497_v30  ;;  %v539_v11 = vpop.permute.xlu1 %538 }
 0x1b4   :  { %1003 = vmatprep.subr.bf16.mxu1 %v507_v33 }
 0x1b5   :  { %1004 = vmatpush3.bf16.msra.mxu1 %v507_v33 }
 0x1b6   :  { %1005 = vmatprep.subr.bf16.mxu1 %v508_v32  ;;  %v547_v61 = vpop.permute.xlu1 %546 }
 0x1b9   :  { %1006 = vmatpush3.bf16.msra.mxu1 %v508_v32 }
 0x1ba   :  { %1023 = vmatprep.subr.bf16.mxu1 %v1094_v42  ;;  %v555_v34 = vpop.permute.xlu1 %554 }
 0x1bc   :  { %1008 = vmatmul.mubr.bf16.vlgmr.msra.gmra.mrb[0].mxu1 %v1072_v35 }
 0x1bd   :  { %1011 = vmatprep.mubr.bf16.mxu1 %v1073_v36  ;;  %v567_v36 = vpop.permute.xlu0 %566 }
 0x1be   :  { %v563_v28 = vpop.permute.xlu1 %562 }
 0x1c4   :  { %1012 = vmatmul.mubr.bf16.gmra.mrb[4].mxu1 %v1074_v37 }
 0x1c5   :  { %1015 = vmatprep.mubr.bf16.mxu1 %v1075_v38 }
 0x1cc   :  { %1016 = vmatmul.mubr.bf16.gmra.mrb[8].mxu1 %v1076_v39 }
 0x1cd   :  { %1019 = vmatprep.mubr.bf16.mxu1 %v1077_v40 }
 0x1d4   :  { %1020 = vmatmul.mubr.bf16.gmra.mrb[12].mxu1 %v1078_v41  ;;  %v571_v41 = vpop.permute.xlu1 %570 }
 0x1d5   :  { %1039 = vmatprep.mubr.msk.bf16.mxu1 %vm1095_vm1, %v1094_v42 }
 0x28f   :  { %v1009_v50 = vpop.f32.mrb[0].mxu1 }
 0x290   :  { %v664_v51 = vadd.f32 %v1009_v50, %v519_v44  ;;  %v655_v10 = vpop.f32.mrb[1].mxu1 }
 0x291   :  { %v656_v52 = vadd.f32 %v655_v10, %v511_v9  ;;  %v1010_v53 = vpop.f32.mrb[2].mxu1  ;;  %v803_v10 = vpop.trf.xlu0 }
 0x292   :  { %v667_v54 = vadd.f32 %v1010_v53, %v523_v46  ;;  %v658_v55 = vpop.f32.mrb[3].mxu1  ;;  %v720_v57 = vmax.f32 %v664_v51, 0.0  ;;  %v861_v53 = vlaneseq }
 0x293   :  { %v659_v56 = vadd.f32 %v658_v55, %v515_v45  ;;  %v718_v12 = vmax.f32 %v656_v52, 0.0 }
 0x294   :  { %v721_v58 = vmax.f32 %v667_v54, 0.0 }
 0x295   :  { %v719_v13 = vmax.f32 %v659_v56, 0.0 }
 0x296   :  { %v735_v60 = vpack.c.bf16 %v721_v58, %v720_v57  ;;  %v862_v58 = vand.u32 127, %v861_v53 }
 0x297   :  { %v734_v62 = vpack.c.bf16 %v719_v13, %v718_v12  ;;  %v1013_v63 = vpop.f32.mrb[4].mxu1 }
 0x298   :  { %v680_v0 = vadd.f32 %v1013_v63, %v535_v49  ;;  %v671_v1 = vpop.f32.mrb[5].mxu1  ;;  %vm863_vm2 = vcmp.lt.s32.totalorder %v862_v58, 16 }
 0x299   :  { %v672_v2 = vadd.f32 %v671_v1, %v527_v47  ;;  %v1014_v14 = vpop.f32.mrb[6].mxu1  ;;  %1024 = vmatpush3.bf16.msra.mxu1 %v734_v62 }
 0x29a   :  { %v683_v15 = vadd.f32 %v1014_v14, %v539_v11  ;;  %v674_v3 = vpop.f32.mrb[7].mxu1  ;;  %1025 = vmatprep.subr.bf16.mxu1 %v1094_v42  ;;  %v724_v16 = vmax.f32 %v680_v0, 0.0  ;;  %v745_v11 = vpop.permute.xlu1 %744 }
 0x29b   :  { %v675_v5 = vadd.f32 %v674_v3, %v531_v48  ;;  %v722_v6 = vmax.f32 %v672_v2, 0.0 }
 0x29c   :  { %v725_v17 = vmax.f32 %v683_v15, 0.0 }
 0x29d   :  { %v723_v7 = vmax.f32 %v675_v5, 0.0  ;;  %1026 = vmatpush3.bf16.msra.mxu1 %v735_v60 }
 0x29e   :  { %v737_v18 = vpack.c.bf16 %v725_v17, %v724_v16  ;;  %1027 = vmatprep.subr.bf16.mxu1 %v1094_v42 }
 0x29f   :  { %v736_v19 = vpack.c.bf16 %v723_v7, %v722_v6  ;;  %v1017_v20 = vpop.f32.mrb[8].mxu1 }
 0x2a0   :  { %v696_v21 = vadd.f32 %v1017_v20, %v551_v4  ;;  %v687_v22 = vpop.f32.mrb[9].mxu1 }
 0x2a1   :  { %v688_v24 = vadd.f32 %v687_v22, %v543_v59  ;;  %v1018_v25 = vpop.f32.mrb[10].mxu1  ;;  %1028 = vmatpush3.bf16.msra.mxu1 %v736_v19 }
 0x2a2   :  { %v699_v26 = vadd.f32 %v1018_v25, %v555_v34  ;;  %v690_v27 = vpop.f32.mrb[11].mxu1  ;;  %1029 = vmatprep.subr.bf16.mxu1 %v1094_v42  ;;  %v728_v30 = vmax.f32 %v696_v21, 0.0 }
 0x2a3   :  { %v691_v29 = vadd.f32 %v690_v27, %v547_v61  ;;  %v726_v32 = vmax.f32 %v688_v24, 0.0 }
 0x2a4   :  { %v729_v31 = vmax.f32 %v699_v26, 0.0 }
 0x2a5   :  { %v727_v33 = vmax.f32 %v691_v29, 0.0  ;;  %1030 = vmatpush3.bf16.msra.mxu1 %v737_v18 }
 0x2a6   :  { %v739_v35 = vpack.c.bf16 %v729_v31, %v728_v30  ;;  %1031 = vmatprep.subr.bf16.mxu1 %v1094_v42 }
 0x2a7   :  { %v738_v37 = vpack.c.bf16 %v727_v33, %v726_v32  ;;  %v1021_v38 = vpop.f32.mrb[12].mxu1 }
 0x2a8   :  { %v712_v39 = vadd.f32 %v1021_v38, %v567_v36  ;;  %v703_v40 = vpop.f32.mrb[13].mxu1 }
 0x2a9   :  { %v704_v43 = vadd.f32 %v703_v40, %v559_v23  ;;  %v1022_v8 = vpop.f32.mrb[14].mxu1  ;;  %1032 = vmatpush3.bf16.msra.mxu1 %v738_v37 }
 0x2aa   :  { %v715_v9 = vadd.f32 %v1022_v8, %v571_v41  ;;  %v706_v44 = vpop.f32.mrb[15].mxu1  ;;  %1033 = vmatprep.subr.bf16.mxu1 %v1094_v42  ;;  %v732_v46 = vmax.f32 %v712_v39, 0.0 }
 0x2ab   :  { %v707_v45 = vadd.f32 %v706_v44, %v563_v28  ;;  %v730_v48 = vmax.f32 %v704_v43, 0.0 }
 0x2ac   :  { %v733_v47 = vmax.f32 %v715_v9, 0.0 }
 0x2ad   :  { %v731_v49 = vmax.f32 %v707_v45, 0.0  ;;  %1034 = vmatpush3.bf16.msra.mxu1 %v739_v35 }
 0x2ae   :  { %v741_v50 = vpack.c.bf16 %v733_v47, %v732_v46  ;;  %1035 = vmatprep.subr.bf16.mxu1 %v1094_v42 }
 0x2af   :  { %v740_v51 = vpack.c.bf16 %v731_v49, %v730_v48 }
 0x2b1   :  { %1036 = vmatpush3.bf16.msra.mxu1 %v740_v51 }
 0x2b2   :  { %1037 = vmatprep.subr.bf16.mxu1 %v1094_v42 }
 0x2b5   :  { %1038 = vmatpush3.bf16.msra.mxu1 %v741_v50 }
 0x2b8   :  { %1040 = vmatmul.mubr.bf16.vlgmr.msra.gmra.mrb[16].mxu1 %v803_v10 }
 0x38b   :  { %v845_v52 = vpop.f32.mrb[16].mxu1 }
 0x38c   :  { %v846_v54 = vadd.f32 %v845_v52, %v745_v11  ;;  %v1041_v55 = vpop.f32.mrb[17].mxu1 }
 0x38d   :  { %v848_v56 = vpop.f32.mrb[18].mxu1 }
 0x38e   :  { %855 = vst [vmem:[%s1515_s4] sm:$0x1] %v846_v54  ;;  %v1042_v57 = vpop.f32.mrb[19].mxu1 }
 0x395   :  { %v860_v42 = vld [vmem:[%s1515_s4] sm:$0x1] }
 0x396   :  { %v864_v59 = vsel %vm863_vm2, %v860_v42, -inf }
 0x397   :  { %v866_v12 = vsel %vm865_vm3, %v864_v59, -inf }
 0x398   :  { %867 = vmax.xlane.f32.xlu1 %v866_v12 }
 0x425   :  { %v868_v13 = vpop.xlane.xlu1 %867 }
 0x426   :  { %v869_v60 = vsub.f32 %v864_v59, %v868_v13 }
 0x428   :  { %v870_v61 = vmul.f32 1.442695, %v869_v60 }
 0x42a   :  { %1087 = vpow2.f32 %v870_v61 }
 0x434   :  { %v1088_v62 = vpop.eup %1087 }
 0x435   :  { %v872_v63 = vsel %vm865_vm3, %v1088_v62, 0.0 }
 0x436   :  { %873 = vadd.xlane.f32.xlu1 %v872_v63 }
 0x4c3   :  { %v874_v0 = vpop.xlane.xlu1 %873 }
 0x4c4   :  { %1089 = vrcp.f32 %v874_v0 }
 0x4ce   :  { %v1090_v1 = vpop.eup %1089 }
 0x4cf   :  { %v876_v2 = vmul.f32 %v1090_v1, %v874_v0 }
 0x4d1   :  { %v877_v14 = vsub.f32 2.0, %v876_v2 }
 0x4d3   :  { %v878_v15 = vmul.f32 %v1090_v1, %v877_v14 }
 0x4d5   :  { %v879_v3 = vmul.f32 %v1088_v62, %v878_v15 }
 0x4d7   :  { %880 = vst [vmem:[%s1515_s4] sm:$0x1] %v879_v3 }

</bundles_post_ra>
